<compile_context>
chip_gen: v6e
topology: v6e:2x2x1
jax: 0.10.0
libtpu: 0.0.40
codegen_flags: <defaults>
</compile_context>

<pallas_src>
import jax
import jax.numpy as jnp
from jax.experimental import pallas as pl
from jax.experimental.pallas import tpu as pltpu


# --------------------------------------------------------------------------- #
# Kernel (batch-in-lanes: every tensor is (features, batch_tile))
# --------------------------------------------------------------------------- #
def mlp_kernel(xt_ref, w1_ref, b1_ref, w2_ref, b2_ref, w3_ref, b3_ref, o_ref):
    mm_dtype = w1_ref.dtype  # MXU operand dtype (f32 or bf16); accumulate in f32

    # fc1 + ReLU: (l1_p, d_in_p) @ (d_in_p, tile_b) -> (l1_p, tile_b)
    h1 = jnp.dot(w1_ref[...], xt_ref[...], preferred_element_type=jnp.float32)
    h1 = jnp.maximum(h1 + b1_ref[...], 0.0)          # bias is a (l1_p, 1) column

    # fc2 + ReLU: (l2_p, l1_p) @ (l1_p, tile_b) -> (l2_p, tile_b)
    h2 = jnp.dot(w2_ref[...], h1.astype(mm_dtype),
                 preferred_element_type=jnp.float32)
    h2 = jnp.maximum(h2 + b2_ref[...], 0.0)

    # dropout: eval mode -> identity.
    # TODO(synk): training-mode dropout not implemented.

    # fc3: (1, l2_p) @ (l2_p, tile_b) -> lane-dense (1, tile_b) row (unmasked vst).
    out = jnp.dot(w3_ref[...], h2.astype(mm_dtype),
                  preferred_element_type=jnp.float32)
    o_ref[...] = (out + b3_ref[0]).astype(o_ref.dtype)        # b3: SMEM scalar


# --------------------------------------------------------------------------- #
# Host-side packing (one-time): pad feature dims to 128, keep PyTorch (out, in)
# weight layout, biases as columns, b3 as an SMEM scalar.
# --------------------------------------------------------------------------- #
def _round_up(n, m):
    return ((n + m - 1) // m) * m


def pack_params(params, *, matmul_dtype=jnp.float32, lane=128):
    (w1, b1), (w2, b2), (w3, b3) = params  # PyTorch layouts: W (out,in), b (out,)
    d_in, l1, l2 = w1.shape[1], w1.shape[0], w2.shape[0]
    d_in_p, l1_p, l2_p = (_round_up(d, lane) for d in (d_in, l1, l2))

    def pad2(a, shape):
        return jnp.zeros(shape, a.dtype).at[: a.shape[0], : a.shape[1]].set(a)

    W1 = pad2(w1, (l1_p, d_in_p)).astype(matmul_dtype)       # (128, 128), torch layout
    W2 = pad2(w2, (l2_p, l1_p)).astype(matmul_dtype)         # (128, 128)
    W3 = pad2(w3, (1, l2_p)).astype(matmul_dtype)            # (1, 128)
    B1 = pad2(b1[:, None], (l1_p, 1)).astype(jnp.float32)    # (128, 1) column, f32
    B2 = pad2(b2[:, None], (l2_p, 1)).astype(jnp.float32)    # (128, 1) column, f32
    B3 = b3.astype(jnp.float32).reshape((1,))                # scalar -> SMEM
    return (W1, B1, W2, B2, W3, B3)


def _choose_tile_b(batch, *, lane=128, cap=2048):
    """Large tiles (amortize ~0.35us/step), but >= 2 tiles for big B (v7x megacore)."""
    if batch <= lane:
        return lane
    half = -(-batch // 2)
    return min(cap, _round_up(half, lane))


def pack_input(x, packed_params, *, tile_b=None):
    """One host pass: cast to the matmul dtype, transpose to batch-in-lanes,
    pad features to 128 sublanes and batch to a multiple of tile_b lanes."""
    W1 = packed_params[0]
    batch, d_in = x.shape
    d_in_p = W1.shape[1]
    if tile_b is None:
        tile_b = _choose_tile_b(batch)
    n_tiles = -(-batch // tile_b)
    b_p = n_tiles * tile_b
    xt = jnp.zeros((d_in_p, b_p), W1.dtype).at[:d_in, :batch].set(
        x.astype(W1.dtype).T)
    return xt, tile_b


# --------------------------------------------------------------------------- #
# Wrappers
# --------------------------------------------------------------------------- #
def mlp_forward_packed(xt, packed_params, *, valid_b, tile_b):
    """Run the fused kernel on an already packed (d_in_p, b_p) input."""
    W1, B1, W2, B2, W3, B3 = packed_params
    d_in_p, b_p = xt.shape
    l1_p, l2_p = W1.shape[0], W2.shape[0]
    assert b_p % tile_b == 0
    n_tiles = b_p // tile_b

    in_specs = [
        pl.BlockSpec((d_in_p, tile_b), lambda i: (0, i)),      # xt tile (pipelined)
        pl.BlockSpec((l1_p, d_in_p), lambda i: (0, 0)),        # W1 (resident)
        pl.BlockSpec((l1_p, 1), lambda i: (0, 0)),             # b1 column
        pl.BlockSpec((l2_p, l1_p), lambda i: (0, 0)),          # W2
        pl.BlockSpec((l2_p, 1), lambda i: (0, 0)),             # b2 column
        pl.BlockSpec((1, l2_p), lambda i: (0, 0)),             # W3 row
        pl.BlockSpec(memory_space=pltpu.MemorySpace.SMEM),     # b3 scalar
    ]
    # Lane-dense output: one (1, tile_b) row per grid step.
    out_specs = pl.BlockSpec((1, tile_b), lambda i: (0, i))

    out_row = pl.pallas_call(
        mlp_kernel,
        out_shape=jax.ShapeDtypeStruct((1, b_p), jnp.float32),
        grid_spec=pltpu.PrefetchScalarGridSpec(
            num_scalar_prefetch=0,
            grid=(n_tiles,),
            in_specs=in_specs,
            out_specs=out_specs,
        ),
        compiler_params=pltpu.CompilerParams(
            dimension_semantics=("parallel",),  # shard batch tiles across TCs (v7x)
        ),
    )(xt, W1, B1, W2, B2, W3, B3)

    # Padded batch columns carry ReLU(bias) garbage by design; slice them away.
    return out_row[0, :valid_b].reshape(valid_b, 1)


def mlp_forward(x, packed_params, *, tile_b=None):
    """Convenience path: packs x (transpose+pad+cast, one host pass) then runs."""
    batch = x.shape[0]
    xt, tile_b = pack_input(x, packed_params, tile_b=tile_b)
    out = mlp_forward_packed(xt, packed_params, valid_b=batch, tile_b=tile_b)
    return out.astype(x.dtype)


# --------------------------------------------------------------------------- #
# Init + pure-JAX reference (PyTorch nn.Linear semantics)
# --------------------------------------------------------------------------- #
def init_params(key, d_in=100, l1=120, l2=84, d_out=1, dtype=jnp.float32):
    """nn.Linear default init: uniform(-1/sqrt(fan_in), 1/sqrt(fan_in)).
    Stored in PyTorch layout: weight (out, in), bias (out,)."""
    ks = jax.random.split(key, 6)

    def lin(kw, kb, fan_in, fan_out):
        bound = 1.0 / (fan_in ** 0.5)
        w = jax.random.uniform(kw, (fan_out, fan_in), dtype, -bound, bound)
        b = jax.random.uniform(kb, (fan_out,), dtype, -bound, bound)
        return w, b

    return (lin(ks[0], ks[1], d_in, l1),
            lin(ks[2], ks[3], l1, l2),
            lin(ks[4], ks[5], l2, d_out))


def mlp_reference(x, params):
    (w1, b1), (w2, b2), (w3, b3) = params
    h1 = jnp.maximum(x @ w1.T + b1, 0.0)
    h2 = jnp.maximum(h1 @ w2.T + b2, 0.0)
    return h2 @ w3.T + b3  # dropout is identity in eval mode


# --------------------------------------------------------------------------- #
if __name__ == "__main__":
    key = jax.random.PRNGKey(0)
    kp, kx_small, kx_big = jax.random.split(key, 3)

    D_IN, L1, L2 = 100, 120, 84
    params = init_params(kp, d_in=D_IN, l1=L1, l2=L2, d_out=1)
    packed_f32 = pack_params(params, matmul_dtype=jnp.float32)

    # Small demo batch -> a single 128-wide tile.
    x_small = jax.random.normal(kx_small, (8, D_IN), dtype=jnp.float32)
    out_small = jax.block_until_ready(mlp_forward(x_small, packed_f32))
    ref_small = mlp_reference(x_small, params)
    assert out_small.shape == (8, 1), out_small.shape
    assert jnp.allclose(out_small, ref_small, atol=1e-4, rtol=1e-4), "f32 small mismatch"

    # Larger, non-tile-multiple batch -> 2 x 512-wide tiles (megacore-shardable).
    x_big = jax.random.normal(kx_big, (1000, D_IN), dtype=jnp.float32)
    out_big = jax.block_until_ready(mlp_forward(x_big, packed_f32))
    ref_big = mlp_reference(x_big, params)
    assert out_big.shape == (1000, 1), out_big.shape
    assert jnp.allclose(out_big, ref_big, atol=1e-4, rtol=1e-4), "f32 big mismatch"

    # Pre-packed-input path (amortizes the host transpose/pad/cast across calls).
    xt_big, tb = pack_input(x_big, packed_f32)
    out_packed = jax.block_until_ready(
        mlp_forward_packed(xt_big, packed_f32, valid_b=1000, tile_b=tb))
    assert jnp.allclose(out_packed, ref_big, atol=1e-4, rtol=1e-4), "packed-x mismatch"

    # bf16 MXU operands (f32 accumulate + f32 bias/ReLU): halves the HBM-bound x
    # stream.  Note: input precision is reduced too (hence the loose tolerance).
    packed_bf16 = pack_params(params, matmul_dtype=jnp.bfloat16)
    out_bf16 = jax.block_until_ready(mlp_forward(x_big, packed_bf16))
    assert jnp.allclose(out_bf16, ref_big, atol=1e-1, rtol=5e-2), "bf16 mismatch"

    print("KERNEL_OK")
</pallas_src>

<mosaic_0001>
module attributes {stable_mosaic.version = 11 : i64} {
  func.func @mlp_kernel(%arg0: i32, %arg1: memref<128x128xf32, #tpu.memory_space<vmem>>, %arg2: memref<128x128xf32, #tpu.memory_space<vmem>>, %arg3: memref<128x1xf32, #tpu.memory_space<vmem>>, %arg4: memref<128x128xf32, #tpu.memory_space<vmem>>, %arg5: memref<128x1xf32, #tpu.memory_space<vmem>>, %arg6: memref<1x128xf32, #tpu.memory_space<vmem>>, %arg7: memref<1xf32, #tpu.memory_space<smem>>, %arg8: memref<1x128xf32, #tpu.memory_space<vmem>>) attributes {dimension_semantics = [#tpu.dimension_semantics<parallel>], iteration_bounds = array<i64: 1>, scalar_prefetch = 0 : i64, scratch_operands = 0 : i64, tpu.core_type = #tpu.core_type<tc>, window_params = [{transform_indices = @transform_0, window_bounds = array<i64: 128, 128>}, {pipeline_mode = #tpu.pipeline_mode<synchronous>, transform_indices = @transform_1, window_bounds = array<i64: 128, 128>}, {pipeline_mode = #tpu.pipeline_mode<synchronous>, transform_indices = @transform_2, window_bounds = array<i64: 128, 1>}, {pipeline_mode = #tpu.pipeline_mode<synchronous>, transform_indices = @transform_3, window_bounds = array<i64: 128, 128>}, {pipeline_mode = #tpu.pipeline_mode<synchronous>, transform_indices = @transform_4, window_bounds = array<i64: 128, 1>}, {pipeline_mode = #tpu.pipeline_mode<synchronous>, transform_indices = @transform_5, window_bounds = array<i64: 1, 128>}, {transform_indices = @transform_6, window_bounds = array<i64: 1>}, {transform_indices = @transform_7, window_bounds = array<i64: 1, 128>}]} {
    %c0 = arith.constant 0 : index
    %c0_0 = arith.constant 0 : index
    %0 = vector.load %arg2[%c0, %c0_0] : memref<128x128xf32, #tpu.memory_space<vmem>>, vector<128x128xf32>
    %c0_1 = arith.constant 0 : index
    %c0_2 = arith.constant 0 : index
    %1 = vector.load %arg1[%c0_1, %c0_2] : memref<128x128xf32, #tpu.memory_space<vmem>>, vector<128x128xf32>
    %cst = arith.constant dense<0.000000e+00> : vector<128x128xf32>
    %2 = tpu.matmul %0, %1, %cst {dimension_numbers = #tpu.dot_dimension_numbers<[1], [0], [0], [1], [0, 0, 1, 1], [], []>} : vector<128x128xf32>, vector<128x128xf32>, vector<128x128xf32> -> vector<128x128xf32>
    %c0_3 = arith.constant 0 : index
    %c0_4 = arith.constant 0 : index
    %3 = vector.load %arg3[%c0_3, %c0_4] : memref<128x1xf32, #tpu.memory_space<vmem>>, vector<128x1xf32>
    %4 = vector.broadcast %3 : vector<128x1xf32> to vector<128x128xf32>
    %5 = arith.addf %2, %4 : vector<128x128xf32>
    %cst_5 = arith.constant 0.000000e+00 : f32
    %6 = vector.broadcast %cst_5 : f32 to vector<128x128xf32>
    %7 = arith.maximumf %5, %6 : vector<128x128xf32>
    %c0_6 = arith.constant 0 : index
    %c0_7 = arith.constant 0 : index
    %8 = vector.load %arg4[%c0_6, %c0_7] : memref<128x128xf32, #tpu.memory_space<vmem>>, vector<128x128xf32>
    %cst_8 = arith.constant dense<0.000000e+00> : vector<128x128xf32>
    %9 = tpu.matmul %8, %7, %cst_8 {dimension_numbers = #tpu.dot_dimension_numbers<[1], [0], [0], [1], [0, 0, 1, 1], [], []>} : vector<128x128xf32>, vector<128x128xf32>, vector<128x128xf32> -> vector<128x128xf32>
    %c0_9 = arith.constant 0 : index
    %c0_10 = arith.constant 0 : index
    %10 = vector.load %arg5[%c0_9, %c0_10] : memref<128x1xf32, #tpu.memory_space<vmem>>, vector<128x1xf32>
    %11 = vector.broadcast %10 : vector<128x1xf32> to vector<128x128xf32>
    %12 = arith.addf %9, %11 : vector<128x128xf32>
    %cst_11 = arith.constant 0.000000e+00 : f32
    %13 = vector.broadcast %cst_11 : f32 to vector<128x128xf32>
    %14 = arith.maximumf %12, %13 : vector<128x128xf32>
    %c0_12 = arith.constant 0 : index
    %c0_13 = arith.constant 0 : index
    %15 = vector.load %arg6[%c0_12, %c0_13] : memref<1x128xf32, #tpu.memory_space<vmem>>, vector<1x128xf32>
    %cst_14 = arith.constant dense<0.000000e+00> : vector<1x128xf32>
    %16 = tpu.matmul %15, %14, %cst_14 {dimension_numbers = #tpu.dot_dimension_numbers<[1], [0], [0], [1], [0, 0, 1, 1], [], []>} : vector<1x128xf32>, vector<128x128xf32>, vector<1x128xf32> -> vector<1x128xf32>
    %c0_15 = arith.constant 0 : index
    %17 = memref.load %arg7[%c0_15] : memref<1xf32, #tpu.memory_space<smem>>
    %18 = vector.broadcast %17 : f32 to vector<1x128xf32>
    %19 = arith.addf %16, %18 : vector<1x128xf32>
    %c0_16 = arith.constant 0 : index
    %c0_17 = arith.constant 0 : index
    %20 = vector.load %arg8[%c0_16, %c0_17] : memref<1x128xf32, #tpu.memory_space<vmem>>, vector<1x128xf32>
    tpu.vector_store %arg8[%c0_16, %c0_17], %19 {strides = array<i32>} : memref<1x128xf32, #tpu.memory_space<vmem>>, vector<1x128xf32>,
    return
  }
  func.func @transform_0(%arg0: i32) -> (i32, i32) {
    %c0_i32 = arith.constant 0 : i32
    %c0_i32_0 = arith.constant 0 : i32
    return %c0_i32, %arg0 : i32, i32
  }
  func.func @transform_1(%arg0: i32) -> (i32, i32) {
    %c0_i32 = arith.constant 0 : i32
    %c0_i32_0 = arith.constant 0 : i32
    %c0_i32_1 = arith.constant 0 : i32
    return %c0_i32, %c0_i32_0 : i32, i32
  }
  func.func @transform_2(%arg0: i32) -> (i32, i32) {
    %c0_i32 = arith.constant 0 : i32
    %c0_i32_0 = arith.constant 0 : i32
    %c0_i32_1 = arith.constant 0 : i32
    return %c0_i32, %c0_i32_0 : i32, i32
  }
  func.func @transform_3(%arg0: i32) -> (i32, i32) {
    %c0_i32 = arith.constant 0 : i32
    %c0_i32_0 = arith.constant 0 : i32
    %c0_i32_1 = arith.constant 0 : i32
    return %c0_i32, %c0_i32_0 : i32, i32
  }
  func.func @transform_4(%arg0: i32) -> (i32, i32) {
    %c0_i32 = arith.constant 0 : i32
    %c0_i32_0 = arith.constant 0 : i32
    %c0_i32_1 = arith.constant 0 : i32
    return %c0_i32, %c0_i32_0 : i32, i32
  }
  func.func @transform_5(%arg0: i32) -> (i32, i32) {
    %c0_i32 = arith.constant 0 : i32
    %c0_i32_0 = arith.constant 0 : i32
    %c0_i32_1 = arith.constant 0 : i32
    return %c0_i32, %c0_i32_0 : i32, i32
  }
  func.func @transform_6(%arg0: i32) -> i32 {
    %c0_i32 = arith.constant 0 : i32
    %c0_i32_0 = arith.constant 0 : i32
    return %c0_i32 : i32
  }
  func.func @transform_7(%arg0: i32) -> (i32, i32) {
    %c0_i32 = arith.constant 0 : i32
    %c0_i32_0 = arith.constant 0 : i32
    return %c0_i32, %arg0 : i32, i32
  }
}

</mosaic_0001>

<bundles_post_ra>
// kernel: tpu_custom_call.1
= control target key start
LH: loop header
LB: loop body
LE: loop exit
PB: predicated region body
PF: predicated region fallthrough
CT: control target
= control target key end

     0   :  { %13 = vsyncpa [#allocation4], 0  ;;  %s1266_s0 = inlined_call_operand.vmem [shape: f32[128,128], index: 0, kind: input, shape index: {}]   ;;  %s1267_s1 = inlined_call_operand.vmem [shape: f32[128,128], index: 1, kind: input, shape index: {}]   ;;  %s1268_s2 = inlined_call_operand.vmem [shape: f32[128,1], index: 2, kind: input, shape index: {}]   ;;  %s1269_s3 = inlined_call_operand.hbm [shape: f32[128,128], index: 3, kind: input, shape index: {}]   ;;  %s1270_s4 = inlined_call_operand.vmem [shape: f32[128,1], index: 4, kind: input, shape index: {}]   ;;  %s1271_s5 = inlined_call_operand.vmem [shape: f32[1,128], index: 5, kind: input, shape index: {}]   ;;  %s1272_s6 = inlined_call_operand.<no memory space> [shape: f32[1], index: 6, kind: input, shape index: {}]   ;;  %s1273_s7 = inlined_call_operand.hbm [shape: f32[1,128], index: 7, kind: output, shape index: {}]  }
   0x1   :  { %14 = vsyncpa [#allocation5], 0  ;;  %s974_s24 = smov [#allocation3]  }
   0x2   :  { %s26_s25 = sshll.u32 %s974_s24, 4  ;;  %s27_s25 = int_to_ptr.vmem [resolvable:$true] %s26_s25 }
   0x3   :  { %s938_s26 = scalar_lea.vmem %s27_s25, 2048  ;;  %p943_p1 = scmp.lt.s32.totalorder %s27_s25, %s27_s25 }
   0x4   :  { %p939_p0 = scmp.ne.s32.totalorder %s27_s25, %s938_s26  ;;  %p944_p2 = scmp.lt.s32.totalorder %s938_s26, %s938_s26 }
   0x6   :  { %p945_p3 = por %p944_p2, %p943_p1 }
   0x8   :  { %p946_p4 = pnand %p945_p3, %p939_p0 }
   0xa   :  { %949 = shalt.err (!%p946_p4)
}
   0xb   :  { %s975_s27 = smov 128   ;;  %s976_s28 = smov 8  }
   0xc   :  { %32 = dma.hbm_to_vmem [thread:$0]  %s1269_s3, 2048, %s27_s25, [#allocation4], %s975_s27, %s975_s27, %s976_s28  }
   0xd   :  { %970 = dma.done.wait [#allocation4], 2048  }
   0xe   :  { %971 = vsyncadd [#allocation4], 4294965248  ;;  %v977_v0 = vmov 0   ;;  %v73_v1 = vld [vmem:[%s1266_s0 + $0x78] sm:$0xff]  ;;  %v72_v2 = vld [vmem:[%s1266_s0 + $0x70] sm:$0xff]  ;;  %vm979_vm0 = vmmov 0  }
   0xf   :  { %928 = vset.pattern.permute.xlu0 %v977_v0  ;;  %929 = vset.pattern.permute.xlu1 %v977_v0  ;;  %v71_v3 = vld [vmem:[%s1266_s0 + $0x68] sm:$0xff]  ;;  %v70_v4 = vld [vmem:[%s1266_s0 + $0x60] sm:$0xff]  ;;  %v69_v6 = vld [vmem:[%s1266_s0 + $0x58] sm:$0xff]  ;;  %s980_s13 = smov [#allocation6]  }
  0x10   :  { %774 = vmatprep.subr.mxu0 %v73_v1  ;;  %v42_v5 = vld [vmem:[%s1267_s1] sm:$0xff]  ;;  %v68_v7 = vld [vmem:[%s1266_s0 + $0x50] sm:$0xff]  ;;  %v67_v8 = vld [vmem:[%s1266_s0 + $0x48] sm:$0xff]  ;;  %s684_s3 = sshll.u32 %s980_s13, 4  ;;  %s685_s3 = int_to_ptr.vmem [resolvable:$true] %s684_s3 }
  0x11   :  { %775 = vmatpush3.msra.mxu0 %v73_v1  ;;  %806 = vmatprep.mubr.f32.mxu0 %v42_v5  ;;  %v89_v9 = vld [vmem:[%s1268_s2 + $0x78] sm:$0xff]  ;;  %v87_v10 = vld [vmem:[%s1268_s2 + $0x68] sm:$0xff]  ;;  %v66_v11 = vld [vmem:[%s1266_s0 + $0x40] sm:$0xff]  ;;  %s950_s14 = scalar_lea.vmem %s685_s3, 16  ;;  %s954_s15 = scalar_lea.vmem %s685_s3, 32 }
  0x12   :  { %776 = vmatprep.subr.mxu0 %v72_v2  ;;  %167 = vperm.xlu0 %928, %v89_v9   ;;  %v88_v12 = vld [vmem:[%s1268_s2 + $0x70] sm:$0xff]  ;;  %v86_v13 = vld [vmem:[%s1268_s2 + $0x60] sm:$0xff]  ;;  %v65_v14 = vld [vmem:[%s1266_s0 + $0x38] sm:$0xff]  ;;  %p951_p5 = scmp.ne.s32.totalorder %s685_s3, %s950_s14  ;;  %p955_p6 = scmp.lt.s32.totalorder %s685_s3, %s685_s3 }
  0x13   :  { %777 = vmatpush3.msra.mxu0 %v72_v2  ;;  %157 = vperm.xlu1 %929, %v87_v10   ;;  %v64_v15 = vld [vmem:[%s1266_s0 + $0x30] sm:$0xff]  ;;  %v85_v16 = vld [vmem:[%s1268_s2 + $0x58] sm:$0xff]  ;;  %v63_v18 = vld [vmem:[%s1266_s0 + $0x28] sm:$0xff]  ;;  %p956_p7 = scmp.lt.s32.totalorder %s954_s15, %s950_s14 }
  0x14   :  { %778 = vmatprep.subr.mxu0 %v71_v3  ;;  %v84_v17 = vld [vmem:[%s1268_s2 + $0x50] sm:$0xff]  ;;  %v62_v19 = vld [vmem:[%s1266_s0 + $0x20] sm:$0xff]  ;;  %v83_v20 = vld [vmem:[%s1268_s2 + $0x48] sm:$0xff] }
  0x15   :  { %779 = vmatpush3.msra.mxu0 %v71_v3  ;;  %v82_v21 = vld [vmem:[%s1268_s2 + $0x40] sm:$0xff]  ;;  %v61_v22 = vld [vmem:[%s1266_s0 + $0x18] sm:$0xff]  ;;  %v60_v23 = vld [vmem:[%s1266_s0 + $0x10] sm:$0xff]  ;;  %p957_p8 = por %p956_p7, %p955_p6 }
  0x16   :  { %780 = vmatprep.subr.mxu0 %v70_v4  ;;  %162 = vperm.xlu0 %928, %v88_v12   ;;  %v81_v24 = vld [vmem:[%s1268_s2 + $0x38] sm:$0xff]  ;;  %v80_v25 = vld [vmem:[%s1268_s2 + $0x30] sm:$0xff]  ;;  %v59_v26 = vld [vmem:[%s1266_s0 + $0x8] sm:$0xff] }
  0x17   :  { %781 = vmatpush3.msra.mxu0 %v70_v4  ;;  %152 = vperm.xlu1 %929, %v86_v13   ;;  %v58_v27 = vld [vmem:[%s1266_s0] sm:$0xff]  ;;  %v79_v28 = vld [vmem:[%s1268_s2 + $0x28] sm:$0xff]  ;;  %v44_v31 = vld [vmem:[%s1267_s1 + $0x10] sm:$0xff]  ;;  %p958_p9 = pnand %p957_p8, %p951_p5 }
  0x18   :  { %782 = vmatprep.subr.mxu0 %v69_v6  ;;  %v78_v29 = vld [vmem:[%s1268_s2 + $0x20] sm:$0xff]  ;;  %v43_v30 = vld [vmem:[%s1267_s1 + $0x8] sm:$0xff]  ;;  %v77_v32 = vld [vmem:[%s1268_s2 + $0x18] sm:$0xff] }
  0x19   :  { %783 = vmatpush3.msra.mxu0 %v69_v6  ;;  %v76_v33 = vld [vmem:[%s1268_s2 + $0x10] sm:$0xff]  ;;  %v45_v34 = vld [vmem:[%s1267_s1 + $0x18] sm:$0xff]  ;;  %v46_v35 = vld [vmem:[%s1267_s1 + $0x20] sm:$0xff] }
  0x1a   :  { %784 = vmatprep.subr.mxu0 %v68_v7  ;;  %147 = vperm.xlu0 %928, %v85_v16   ;;  %v75_v36 = vld [vmem:[%s1268_s2 + $0x8] sm:$0xff]  ;;  %v74_v37 = vld [vmem:[%s1268_s2] sm:$0xff]  ;;  %v48_v39 = vld [vmem:[%s1267_s1 + $0x30] sm:$0xff] }
  0x1b   :  { %785 = vmatpush3.msra.mxu0 %v68_v7  ;;  %142 = vperm.xlu1 %929, %v84_v17   ;;  %v47_v38 = vld [vmem:[%s1267_s1 + $0x28] sm:$0xff]  ;;  %v362_v40 = vld [vmem:[%s1270_s4 + $0x78] sm:$0xff]  ;;  %v361_v41 = vld [vmem:[%s1270_s4 + $0x70] sm:$0xff] }
  0x1c   :  { %786 = vmatprep.subr.mxu0 %v67_v8  ;;  %v49_v42 = vld [vmem:[%s1267_s1 + $0x38] sm:$0xff]  ;;  %v50_v43 = vld [vmem:[%s1267_s1 + $0x40] sm:$0xff]  ;;  %v360_v44 = vld [vmem:[%s1270_s4 + $0x68] sm:$0xff] }
  0x1d   :  { %787 = vmatpush3.msra.mxu0 %v67_v8  ;;  %v359_v45 = vld [vmem:[%s1270_s4 + $0x60] sm:$0xff]  ;;  %v51_v46 = vld [vmem:[%s1267_s1 + $0x48] sm:$0xff]  ;;  %v52_v47 = vld [vmem:[%s1267_s1 + $0x50] sm:$0xff] }
  0x1e   :  { %788 = vmatprep.subr.mxu0 %v66_v11  ;;  %137 = vperm.xlu0 %928, %v83_v20   ;;  %v358_v48 = vld [vmem:[%s1270_s4 + $0x58] sm:$0xff]  ;;  %v357_v49 = vld [vmem:[%s1270_s4 + $0x50] sm:$0xff]  ;;  %v54_v51 = vld [vmem:[%s1267_s1 + $0x60] sm:$0xff] }
  0x1f   :  { %789 = vmatpush3.msra.mxu0 %v66_v11  ;;  %132 = vperm.xlu1 %929, %v82_v21   ;;  %v53_v50 = vld [vmem:[%s1267_s1 + $0x58] sm:$0xff]  ;;  %v356_v52 = vld [vmem:[%s1270_s4 + $0x48] sm:$0xff]  ;;  %v355_v53 = vld [vmem:[%s1270_s4 + $0x40] sm:$0xff] }
  0x20   :  { %790 = vmatprep.subr.mxu0 %v65_v14  ;;  %v55_v54 = vld [vmem:[%s1267_s1 + $0x68] sm:$0xff]  ;;  %v56_v55 = vld [vmem:[%s1267_s1 + $0x70] sm:$0xff]  ;;  %v354_v56 = vld [vmem:[%s1270_s4 + $0x38] sm:$0xff] }
  0x21   :  { %791 = vmatpush3.msra.mxu0 %v65_v14  ;;  %v353_v57 = vld [vmem:[%s1270_s4 + $0x30] sm:$0xff]  ;;  %v57_v58 = vld [vmem:[%s1267_s1 + $0x78] sm:$0xff]  ;;  %v352_v59 = vld [vmem:[%s1270_s4 + $0x28] sm:$0xff] }
  0x22   :  { %792 = vmatprep.subr.mxu0 %v64_v15  ;;  %127 = vperm.xlu0 %928, %v81_v24   ;;  %v351_v60 = vld [vmem:[%s1270_s4 + $0x20] sm:$0xff]  ;;  %v350_v61 = vld [vmem:[%s1270_s4 + $0x18] sm:$0xff]  ;;  %v349_v62 = vld [vmem:[%s1270_s4 + $0x10] sm:$0xff] }
  0x23   :  { %793 = vmatpush3.msra.mxu0 %v64_v15  ;;  %122 = vperm.xlu1 %929, %v80_v25   ;;  %v348_v63 = vld [vmem:[%s1270_s4 + $0x8] sm:$0xff]  ;;  %v347_v0 = vld [vmem:[%s1270_s4] sm:$0xff] }
  0x24   :  { %794 = vmatprep.subr.mxu0 %v63_v18  ;;  %v331_v1 = vld [vmem:[#allocation3] sm:$0xff] }
  0x25   :  { %795 = vmatpush3.msra.mxu0 %v63_v18  ;;  %862 = vmatprep.mubr.f32.mxu1 %v331_v1 }
  0x26   :  { %796 = vmatprep.subr.mxu0 %v62_v19  ;;  %117 = vperm.xlu0 %928, %v79_v28  }
  0x27   :  { %797 = vmatpush3.msra.mxu0 %v62_v19  ;;  %112 = vperm.xlu1 %929, %v78_v29  }
  0x28   :  { %798 = vmatprep.subr.mxu0 %v61_v22 }
  0x29   :  { %799 = vmatpush3.msra.mxu0 %v61_v22 }
  0x2a   :  { %800 = vmatprep.subr.mxu0 %v60_v23  ;;  %107 = vperm.xlu0 %928, %v77_v32  }
  0x2b   :  { %801 = vmatpush3.msra.mxu0 %v60_v23  ;;  %102 = vperm.xlu1 %929, %v76_v33  }
  0x2c   :  { %802 = vmatprep.subr.mxu0 %v59_v26 }
  0x2d   :  { %803 = vmatpush3.msra.mxu0 %v59_v26 }
  0x2e   :  { %804 = vmatprep.subr.mxu0 %v58_v27  ;;  %97 = vperm.xlu0 %928, %v75_v36  }
  0x2f   :  { %805 = vmatpush3.msra.mxu0 %v58_v27  ;;  %92 = vperm.xlu1 %929, %v74_v37  }
  0x30   :  { %807 = vmatmul.mubr.f32.vlgmr.msra.gmra.mxu0 %v43_v30 }
  0x31   :  { %809 = vmatprep.mubr.f32.mxu0 %v44_v31 }
  0x32   :  { %440 = vperm.xlu0 %928, %v362_v40  }
  0x33   :  { %435 = vperm.xlu1 %929, %v361_v41  }
  0x34   :  { %810 = vmatmul.mubr.f32.gmra.mxu0 %v45_v34 }
  0x35   :  { %812 = vmatprep.mubr.f32.mxu0 %v46_v35 }
  0x36   :  { %430 = vperm.xlu0 %928, %v360_v44  }
  0x37   :  { %425 = vperm.xlu1 %929, %v359_v45  }
  0x38   :  { %813 = vmatmul.mubr.f32.gmra.mxu0 %v47_v38 }
  0x39   :  { %815 = vmatprep.mubr.f32.mxu0 %v48_v39 }
  0x3a   :  { %420 = vperm.xlu0 %928, %v358_v48  }
  0x3b   :  { %415 = vperm.xlu1 %929, %v357_v49  }
  0x3c   :  { %816 = vmatmul.mubr.f32.gmra.mxu0 %v49_v42 }
  0x3d   :  { %818 = vmatprep.mubr.f32.mxu0 %v50_v43 }
  0x3e   :  { %410 = vperm.xlu0 %928, %v356_v52  }
  0x3f   :  { %405 = vperm.xlu1 %929, %v355_v53  }
  0x40   :  { %819 = vmatmul.mubr.f32.gmra.mxu0 %v51_v46 }
  0x41   :  { %821 = vmatprep.mubr.f32.mxu0 %v52_v47 }
  0x42   :  { %400 = vperm.xlu0 %928, %v354_v56  }
  0x43   :  { %395 = vperm.xlu1 %929, %v353_v57  }
  0x44   :  { %822 = vmatmul.mubr.f32.gmra.mxu0 %v53_v50 }
  0x45   :  { %824 = vmatprep.mubr.f32.mxu0 %v54_v51 }
  0x46   :  { %390 = vperm.xlu0 %928, %v352_v59  }
  0x47   :  { %385 = vperm.xlu1 %929, %v351_v60  }
  0x48   :  { %825 = vmatmul.mubr.f32.gmra.mxu0 %v55_v54 }
  0x49   :  { %827 = vmatprep.mubr.f32.mxu0 %v56_v55 }
  0x4a   :  { %380 = vperm.xlu0 %928, %v350_v61  }
  0x4b   :  { %375 = vperm.xlu1 %929, %v349_v62  }
  0x4c   :  { %828 = vmatmul.mubr.f32.gmra.mxu0 %v57_v58 }
  0x4e   :  { %370 = vperm.xlu0 %928, %v348_v63  }
  0x4f   :  { %365 = vperm.xlu1 %929, %v347_v0  }
  0x8d   :  { %v168_v8 = vpop.permute.xlu0 %167 }
  0x8e   :  { %v158_v10 = vpop.permute.xlu1 %157 }
  0x91   :  { %v163_v13 = vpop.permute.xlu0 %162 }
  0x92   :  { %v153_v15 = vpop.permute.xlu1 %152 }
  0x95   :  { %v148_v18 = vpop.permute.xlu0 %147 }
  0x96   :  { %v143_v20 = vpop.permute.xlu1 %142 }
  0x99   :  { %v138_v24 = vpop.permute.xlu0 %137 }
  0x9a   :  { %v133_v29 = vpop.permute.xlu1 %132 }
  0x9d   :  { %v128_v34 = vpop.permute.xlu0 %127 }
  0x9e   :  { %v123_v37 = vpop.permute.xlu1 %122 }
  0xa1   :  { %v118_v42 = vpop.permute.xlu0 %117 }
  0xa2   :  { %v113_v45 = vpop.permute.xlu1 %112 }
  0xa5   :  { %v108_v50 = vpop.permute.xlu0 %107 }
  0xa6   :  { %v103_v53 = vpop.permute.xlu1 %102 }
  0xa9   :  { %v98_v58 = vpop.permute.xlu0 %97 }
  0xaa   :  { %v93_v61 = vpop.permute.xlu1 %92 }
  0xf0   :  { %v1216_v2 = vpop.f32.mrf.mxu0 }
  0xf1   :  { %v242_v59 = vadd.f32 %v1216_v2, %v98_v58  ;;  %v334_v2 = vld [vmem:[#allocation3 + $0x18] sm:$0xff] }
  0xf2   :  { %v1218_v3 = vpop.f32.mrf.mxu0 }
  0xf3   :  { %v237_v62 = vadd.f32 %v1218_v3, %v93_v61  ;;  %v316_v0 = vmax.f32 %v242_v59, 0.0  ;;  %v336_v3 = vld [vmem:[#allocation3 + $0x28] sm:$0xff] }
  0xf4   :  { %v1220_v4 = vpop.f32.mrf.mxu0 }
  0xf5   :  { %v252_v54 = vadd.f32 %v1220_v4, %v108_v50  ;;  %v315_v1 = vmax.f32 %v237_v62, 0.0  ;;  %v332_v4 = vld [vmem:[#allocation3 + $0x8] sm:$0xff] }
  0xf6   :  { %v1222_v5 = vpop.f32.mrf.mxu0 }
  0xf7   :  { %v247_v56 = vadd.f32 %v1222_v5, %v103_v53  ;;  %v318_v60 = vmax.f32 %v252_v54, 0.0  ;;  %v333_v5 = vld [vmem:[#allocation3 + $0x10] sm:$0xff] }
  0xf8   :  { %v814_v6 = vpop.f32.mrf.mxu0 }
  0xf9   :  { %v262_v48 = vadd.f32 %v814_v6, %v118_v42  ;;  %v317_v63 = vmax.f32 %v247_v56, 0.0  ;;  %v335_v6 = vld [vmem:[#allocation3 + $0x20] sm:$0xff] }
  0xfa   :  { %v256_v7 = vpop.f32.mrf.mxu0 }
  0xfb   :  { %v257_v51 = vadd.f32 %v256_v7, %v113_v45  ;;  %v320_v55 = vmax.f32 %v262_v48, 0.0  ;;  %v337_v7 = vld [vmem:[#allocation3 + $0x30] sm:$0xff] }
  0xfc   :  { %v817_v9 = vpop.f32.mrf.mxu0 }
  0xfd   :  { %v272_v43 = vadd.f32 %v817_v9, %v128_v34  ;;  %v319_v57 = vmax.f32 %v257_v51, 0.0  ;;  %v339_v9 = vld [vmem:[#allocation3 + $0x40] sm:$0xff] }
  0xfe   :  { %v266_v11 = vpop.f32.mrf.mxu0 }
  0xff   :  { %v267_v46 = vadd.f32 %v266_v11, %v123_v37  ;;  %v322_v49 = vmax.f32 %v272_v43, 0.0  ;;  %v341_v11 = vld [vmem:[#allocation3 + $0x50] sm:$0xff] }
 0x100   :  { %v820_v12 = vpop.f32.mrf.mxu0 }
 0x101   :  { %v282_v38 = vadd.f32 %v820_v12, %v138_v24  ;;  %v321_v52 = vmax.f32 %v267_v46, 0.0  ;;  %v342_v12 = vld [vmem:[#allocation3 + $0x58] sm:$0xff]  ;;  %v441_v24 = vpop.permute.xlu0 %440 }
 0x102   :  { %v276_v14 = vpop.f32.mrf.mxu0 }
 0x103   :  { %v277_v40 = vadd.f32 %v276_v14, %v133_v29  ;;  %v324_v44 = vmax.f32 %v282_v38, 0.0  ;;  %v344_v14 = vld [vmem:[#allocation3 + $0x68] sm:$0xff] }
 0x104   :  { %v823_v16 = vpop.f32.mrf.mxu0 }
 0x105   :  { %v292_v32 = vadd.f32 %v823_v16, %v148_v18  ;;  %v323_v47 = vmax.f32 %v277_v40, 0.0  ;;  %v346_v16 = vld [vmem:[#allocation3 + $0x78] sm:$0xff]  ;;  %v431_v29 = vpop.permute.xlu0 %430 }
 0x106   :  { %v286_v17 = vpop.f32.mrf.mxu0 }
 0x107   :  { %v287_v35 = vadd.f32 %v286_v17, %v143_v20  ;;  %v326_v39 = vmax.f32 %v292_v32, 0.0  ;;  %v978_v17 = vmov 0.0  }
 0x108   :  { %v826_v19 = vpop.f32.mrf.mxu0  ;;  %886 = vmatprep.subr.mxu0 %v978_v17  ;;  %918 = vmatprep.mubr.msk.f32.mxu0 %vm979_vm0, %v978_v17 }
 0x109   :  { %v302_v26 = vadd.f32 %v826_v19, %v158_v10  ;;  %v325_v41 = vmax.f32 %v287_v35, 0.0  ;;  %v340_v10 = vld [vmem:[#allocation3 + $0x48] sm:$0xff]  ;;  %v421_v34 = vpop.permute.xlu0 %420 }
 0x10a   :  { %v296_v21 = vpop.f32.mrf.mxu0 }
 0x10b   :  { %v297_v30 = vadd.f32 %v296_v21, %v153_v15  ;;  %v328_v33 = vmax.f32 %v302_v26, 0.0  ;;  %v345_v15 = vld [vmem:[#allocation3 + $0x70] sm:$0xff]  ;;  %v436_v26 = vpop.permute.xlu1 %435 }
 0x10c   :  { %v829_v22 = vpop.f32.mrf.mxu0 }
 0x10d   :  { %v312_v23 = vadd.f32 %v829_v22, %v168_v8  ;;  %v327_v36 = vmax.f32 %v297_v30, 0.0  ;;  %v338_v8 = vld [vmem:[#allocation3 + $0x38] sm:$0xff]  ;;  %v411_v40 = vpop.permute.xlu0 %410 }
 0x10e   :  { %v306_v25 = vpop.f32.mrf.mxu0 }
 0x10f   :  { %v330_v27 = vmax.f32 %v312_v23, 0.0  ;;  %v307_v28 = vadd.f32 %v306_v25, %v163_v13  ;;  %v343_v13 = vld [vmem:[#allocation3 + $0x60] sm:$0xff] }
 0x111   :  { %v329_v31 = vmax.f32 %v307_v28, 0.0  ;;  %830 = vmatprep.subr.mxu1 %v330_v27  ;;  %v401_v50 = vpop.permute.xlu0 %400 }
 0x112   :  { %831 = vmatpush3.msra.mxu1 %v330_v27 }
 0x113   :  { %832 = vmatprep.subr.mxu1 %v329_v31 }
 0x114   :  { %833 = vmatpush3.msra.mxu1 %v329_v31  ;;  %v426_v31 = vpop.permute.xlu1 %425 }
 0x115   :  { %834 = vmatprep.subr.mxu1 %v328_v33  ;;  %v391_v58 = vpop.permute.xlu0 %390 }
 0x116   :  { %835 = vmatpush3.msra.mxu1 %v328_v33 }
 0x117   :  { %836 = vmatprep.subr.mxu1 %v327_v36 }
 0x118   :  { %837 = vmatpush3.msra.mxu1 %v327_v36  ;;  %v416_v36 = vpop.permute.xlu1 %415 }
 0x119   :  { %838 = vmatprep.subr.mxu1 %v326_v39 }
 0x11a   :  { %839 = vmatpush3.msra.mxu1 %v326_v39 }
 0x11b   :  { %840 = vmatprep.subr.mxu1 %v325_v41 }
 0x11c   :  { %841 = vmatpush3.msra.mxu1 %v325_v41  ;;  %v406_v45 = vpop.permute.xlu1 %405 }
 0x11d   :  { %842 = vmatprep.subr.mxu1 %v324_v44 }
 0x11e   :  { %843 = vmatpush3.msra.mxu1 %v324_v44 }
 0x11f   :  { %844 = vmatprep.subr.mxu1 %v323_v47 }
 0x120   :  { %845 = vmatpush3.msra.mxu1 %v323_v47  ;;  %v396_v53 = vpop.permute.xlu1 %395 }
 0x121   :  { %846 = vmatprep.subr.mxu1 %v322_v49 }
 0x122   :  { %847 = vmatpush3.msra.mxu1 %v322_v49 }
 0x123   :  { %848 = vmatprep.subr.mxu1 %v321_v52 }
 0x124   :  { %849 = vmatpush3.msra.mxu1 %v321_v52  ;;  %v386_v61 = vpop.permute.xlu1 %385 }
 0x125   :  { %850 = vmatprep.subr.mxu1 %v320_v55 }
 0x126   :  { %851 = vmatpush3.msra.mxu1 %v320_v55 }
 0x127   :  { %852 = vmatprep.subr.mxu1 %v319_v57 }
 0x128   :  { %853 = vmatpush3.msra.mxu1 %v319_v57 }
 0x129   :  { %854 = vmatprep.subr.mxu1 %v318_v60 }
 0x12a   :  { %855 = vmatpush3.msra.mxu1 %v318_v60 }
 0x12b   :  { %856 = vmatprep.subr.mxu1 %v317_v63 }
 0x12c   :  { %857 = vmatpush3.msra.mxu1 %v317_v63 }
 0x12d   :  { %858 = vmatprep.subr.mxu1 %v316_v0 }
 0x12e   :  { %859 = vmatpush3.msra.mxu1 %v316_v0 }
 0x12f   :  { %860 = vmatprep.subr.mxu1 %v315_v1 }
 0x130   :  { %861 = vmatpush3.msra.mxu1 %v315_v1 }
 0x131   :  { %863 = vmatmul.mubr.f32.vlgmr.msra.gmra.mxu1 %v332_v4  ;;  %v381_v4 = vpop.permute.xlu0 %380 }
 0x132   :  { %865 = vmatprep.mubr.f32.mxu1 %v333_v5 }
 0x135   :  { %866 = vmatmul.mubr.f32.gmra.mxu1 %v334_v2 }
 0x136   :  { %868 = vmatprep.mubr.f32.mxu1 %v335_v6  ;;  %v376_v6 = vpop.permute.xlu1 %375 }
 0x139   :  { %869 = vmatmul.mubr.f32.gmra.mxu1 %v336_v3 }
 0x13a   :  { %871 = vmatprep.mubr.f32.mxu1 %v337_v7 }
 0x13d   :  { %872 = vmatmul.mubr.f32.gmra.mxu1 %v338_v8 }
 0x13e   :  { %874 = vmatprep.mubr.f32.mxu1 %v339_v9 }
 0x141   :  { %875 = vmatmul.mubr.f32.gmra.mxu1 %v340_v10  ;;  %v371_v10 = vpop.permute.xlu0 %370 }
 0x142   :  { %877 = vmatprep.mubr.f32.mxu1 %v341_v11 }
 0x145   :  { %878 = vmatmul.mubr.f32.gmra.mxu1 %v342_v12 }
 0x146   :  { %880 = vmatprep.mubr.f32.mxu1 %v343_v13  ;;  %v366_v13 = vpop.permute.xlu1 %365 }
 0x149   :  { %881 = vmatmul.mubr.f32.gmra.mxu1 %v344_v14 }
 0x14a   :  { %883 = vmatprep.mubr.f32.mxu1 %v345_v15 }
 0x14d   :  { %884 = vmatmul.mubr.f32.gmra.mxu1 %v346_v16 }
 0x1f1   :  { %v1230_v18 = vpop.f32.mrf.mxu1 }
 0x1f2   :  { %v515_v11 = vadd.f32 %v1230_v18, %v371_v10  ;;  %v604_v18 = vld [vmem:[%s1271_s5] sm:$0x1] }
 0x1f3   :  { %v1232_v19 = vpop.f32.mrf.mxu1 }
 0x1f4   :  { %v510_v14 = vadd.f32 %v1232_v19, %v366_v13  ;;  %v589_v16 = vmax.f32 %v515_v11, 0.0  ;;  %v606_v19 = vstv %s1272_s6 }
 0x1f5   :  { %v1234_v20 = vpop.f32.mrf.mxu1 }
 0x1f6   :  { %v525_v3 = vadd.f32 %v1234_v20, %v381_v4  ;;  %v588_v20 = vmax.f32 %v510_v14, 0.0 }
 0x1f7   :  { %v1236_v21 = vpop.f32.mrf.mxu1 }
 0x1f8   :  { %v520_v8 = vadd.f32 %v1236_v21, %v376_v6  ;;  %v591_v12 = vmax.f32 %v525_v3, 0.0 }
 0x1f9   :  { %v870_v22 = vpop.f32.mrf.mxu1 }
 0x1fa   :  { %v535_v0 = vadd.f32 %v870_v22, %v391_v58  ;;  %v590_v15 = vmax.f32 %v520_v8, 0.0 }
 0x1fb   :  { %v529_v23 = vpop.f32.mrf.mxu1 }
 0x1fc   :  { %v530_v5 = vadd.f32 %v529_v23, %v386_v61  ;;  %v593_v7 = vmax.f32 %v535_v0, 0.0 }
 0x1fd   :  { %v873_v25 = vpop.f32.mrf.mxu1 }
 0x1fe   :  { %v545_v59 = vadd.f32 %v873_v25, %v401_v50  ;;  %v592_v9 = vmax.f32 %v530_v5, 0.0 }
 0x1ff   :  { %v539_v27 = vpop.f32.mrf.mxu1 }
 0x200   :  { %v540_v62 = vadd.f32 %v539_v27, %v396_v53  ;;  %v595_v1 = vmax.f32 %v545_v59, 0.0 }
 0x201   :  { %v876_v28 = vpop.f32.mrf.mxu1 }
 0x202   :  { %v555_v54 = vadd.f32 %v876_v28, %v411_v40  ;;  %v594_v2 = vmax.f32 %v540_v62, 0.0 }
 0x203   :  { %v549_v30 = vpop.f32.mrf.mxu1 }
 0x204   :  { %v550_v56 = vadd.f32 %v549_v30, %v406_v45  ;;  %v597_v60 = vmax.f32 %v555_v54, 0.0 }
 0x205   :  { %v879_v32 = vpop.f32.mrf.mxu1 }
 0x206   :  { %v565_v48 = vadd.f32 %v879_v32, %v421_v34  ;;  %v596_v63 = vmax.f32 %v550_v56, 0.0 }
 0x207   :  { %v559_v33 = vpop.f32.mrf.mxu1 }
 0x208   :  { %v560_v51 = vadd.f32 %v559_v33, %v416_v36  ;;  %v599_v55 = vmax.f32 %v565_v48, 0.0 }
 0x209   :  { %v882_v35 = vpop.f32.mrf.mxu1 }
 0x20a   :  { %v575_v42 = vadd.f32 %v882_v35, %v431_v29  ;;  %v598_v57 = vmax.f32 %v560_v51, 0.0 }
 0x20b   :  { %v569_v37 = vpop.f32.mrf.mxu1 }
 0x20c   :  { %v570_v46 = vadd.f32 %v569_v37, %v426_v31  ;;  %v601_v49 = vmax.f32 %v575_v42, 0.0 }
 0x20d   :  { %v885_v38 = vpop.f32.mrf.mxu1 }
 0x20e   :  { %v585_v39 = vadd.f32 %v885_v38, %v441_v24  ;;  %v600_v52 = vmax.f32 %v570_v46, 0.0 }
 0x20f   :  { %v579_v41 = vpop.f32.mrf.mxu1 }
 0x210   :  { %v603_v43 = vmax.f32 %v585_v39, 0.0  ;;  %v580_v44 = vadd.f32 %v579_v41, %v436_v26 }
 0x212   :  { %v602_v47 = vmax.f32 %v580_v44, 0.0  ;;  %887 = vmatpush3.msra.mxu0 %v603_v43 }
 0x213   :  { %888 = vmatprep.subr.mxu0 %v978_v17 }
 0x214   :  { %889 = vmatpush3.msra.mxu0 %v602_v47 }
 0x215   :  { %890 = vmatprep.subr.mxu0 %v978_v17 }
 0x216   :  { %891 = vmatpush3.msra.mxu0 %v601_v49 }
 0x217   :  { %892 = vmatprep.subr.mxu0 %v978_v17 }
 0x218   :  { %893 = vmatpush3.msra.mxu0 %v600_v52 }
 0x219   :  { %894 = vmatprep.subr.mxu0 %v978_v17 }
 0x21a   :  { %895 = vmatpush3.msra.mxu0 %v599_v55 }
 0x21b   :  { %896 = vmatprep.subr.mxu0 %v978_v17 }
 0x21c   :  { %897 = vmatpush3.msra.mxu0 %v598_v57 }
 0x21d   :  { %898 = vmatprep.subr.mxu0 %v978_v17 }
 0x21e   :  { %899 = vmatpush3.msra.mxu0 %v597_v60 }
 0x21f   :  { %900 = vmatprep.subr.mxu0 %v978_v17 }
 0x220   :  { %901 = vmatpush3.msra.mxu0 %v596_v63 }
 0x221   :  { %902 = vmatprep.subr.mxu0 %v978_v17 }
 0x222   :  { %903 = vmatpush3.msra.mxu0 %v595_v1 }
 0x223   :  { %904 = vmatprep.subr.mxu0 %v978_v17 }
 0x224   :  { %905 = vmatpush3.msra.mxu0 %v594_v2 }
 0x225   :  { %906 = vmatprep.subr.mxu0 %v978_v17 }
 0x226   :  { %907 = vmatpush3.msra.mxu0 %v593_v7 }
 0x227   :  { %908 = vmatprep.subr.mxu0 %v978_v17 }
 0x228   :  { %909 = vmatpush3.msra.mxu0 %v592_v9 }
 0x229   :  { %910 = vmatprep.subr.mxu0 %v978_v17 }
 0x22a   :  { %911 = vmatpush3.msra.mxu0 %v591_v12 }
 0x22b   :  { %912 = vmatprep.subr.mxu0 %v978_v17 }
 0x22c   :  { %913 = vmatpush3.msra.mxu0 %v590_v15 }
 0x22d   :  { %914 = vmatprep.subr.mxu0 %v978_v17 }
 0x22e   :  { %915 = vmatpush3.msra.mxu0 %v589_v16 }
 0x22f   :  { %916 = vmatprep.subr.mxu0 %v978_v17 }
 0x230   :  { %917 = vmatpush3.msra.mxu0 %v588_v20 }
 0x231   :  { %919 = vmatmul.mubr.f32.vlgmr.msra.gmra.mxu0 %v604_v18 }
 0x2f1   :  { %v673_v21 = vpop.f32.mrf.mxu0 }
 0x2f2   :  { %v674_v22 = vadd.f32 %v673_v21, %v606_v19 }
 0x2f3   :  { %v920_v23 = vpop.f32.mrf.mxu0 }
 0x2f4   :  { %677 = vst [vmem:[#allocation6] sm:$0x1] %v674_v22 }
 0x2f5   :  { %961 = shalt.err (!%p958_p9)
}
 0x2f6   :  { %687 = dma.vmem_to_hbm [thread:$0]  %s685_s3, 16, %s1273_s7, [#allocation5]  }
 0x2f7   :  { %972 = dma.done.wait [#allocation5], 16  }
 0x2f8   :  { %973 = vsyncadd [#allocation5], 4294967280 }
 0x2f9   :  { %691 = vsyncpa [#allocation4], 1 }
 0x2fa   :  { %692 = vsyncpa [#allocation5], 1 }

</bundles_post_ra>
